<compile_context>
chip_gen: v5e
topology: v5e:2x2
jax: 0.10.0
libtpu: 0.0.40
codegen_flags: <defaults>
</compile_context>

<pallas_src>
import numpy as np
import jax
import jax.numpy as jnp
from jax import lax
from jax.experimental import pallas as pl
from jax.experimental.pallas import tpu as pltpu

# ----------------------------- problem sizes --------------------------------
T = 8            # sequence length (len_total)
B = 2            # batch size (bsz) per sequence
BP = 8           # stacked batch (2*B) padded up to the f32 sublane tile of 8
H = 32           # hidden dim (encoder.hdim == embedding dim)
VOCAB = 16
PADDING_IDX = 0
NUM_CLASSES = 2


# ----------------------------- fused kernel ---------------------------------
def fused_model_kernel(seq1_ref, seq2_ref, proj_ref, whh_ref, wclf_ref,
                       bclf_ref, out_ref):
    # ---- stack seq1 | seq2 along a BP=8 padded batch (columns), in-kernel -----
    # Built with iota + where broadcasts of single-column slices; columns >= 2B
    # stay PADDING_IDX and are ignored after the loop.
    bpos = lax.broadcasted_iota(jnp.int32, (T, BP), 1)             # batch position
    ids = jnp.zeros((T, BP), jnp.int32)
    for s, sref in enumerate((seq1_ref, seq2_ref)):
        for k in range(B):
            ids = jnp.where(bpos == s * B + k, sref[:, k:k + 1], ids)   # (T, BP)

    # ---- lens + "capture output[lens-1]" mask, computed in-kernel -------------
    lens_row = jnp.sum((ids != PADDING_IDX).astype(jnp.int32),
                       axis=0, keepdims=True)                       # (1, BP)
    step1 = lax.broadcasted_iota(jnp.int32, (T, BP), 0) + 1         # t+1 per row
    # capture at step t iff lens == t+1; lens == 0 (all-padding row) wraps to the
    # last step, matching PyTorch's output[-1] behaviour for lens[b]-1 == -1.
    cap = (step1 == lens_row) | ((step1 == T) & (lens_row == 0))    # (T, BP) bool
    cap_bt = jnp.transpose(cap.astype(jnp.float32))                 # (BP, T) f32 0/1

    # ---- embedding lookup + hoisted input projection --------------------------
    # proj_ref already holds emb @ Wih + b_rnn (folded once at param-setup time);
    # one-hot selection applies the bias exactly once per token.
    onehot = (ids[:, :, None] ==
              lax.broadcasted_iota(jnp.int32, (T, BP, VOCAB), 2)
              ).astype(jnp.float32)                                 # (T, BP, VOCAB)
    xproj = jnp.dot(onehot.reshape(T * BP, VOCAB), proj_ref[...],
                    preferred_element_type=jnp.float32
                    ).reshape(T, BP, H)                             # (T, BP, H)

    # ---- recurrence: t=0 peeled (h_{-1}==0), bf16 MXU inputs, f32 everywhere else
    whh = whh_ref[...]                                              # (H, H) bf16
    h = jnp.tanh(xproj[0])                                          # (BP, H) f32
    reps = cap_bt[:, 0:1] * h
    for t in range(1, T):                                           # static unroll, T=8
        h = jnp.tanh(xproj[t] +
                     jnp.dot(h.astype(jnp.bfloat16), whh,
                             preferred_element_type=jnp.float32))
        reps = reps + cap_bt[:, t:t + 1] * h                        # off the serial chain

    # ---- classifier: [u1, u2, u1*u2, |u1-u2|] @ W + b  (single f32 MXU pass) ---
    r1 = reps[0:B, :]
    r2 = reps[B:2 * B, :]
    u = jnp.concatenate([r1, r2, r1 * r2, jnp.abs(r1 - r2)], axis=-1)   # (B, 4H)
    out_ref[...] = jnp.dot(u, wclf_ref[...],
                           preferred_element_type=jnp.float32) + bclf_ref[...]


# ----------------------------- parameter preprocessing -----------------------
def prepare_params(params):
    """One-time parameter preprocessing (reused across calls, NOT per-call)."""
    emb_table, wih, whh, b_rnn, w_clf, b_clf = params
    # Fold the input projection and RNN bias into the embedding table:
    #   proj_tbl[id] = emb[id] @ Wih + b   (padding row -> b, selected exactly once)
    proj_tbl = (jnp.dot(emb_table, wih) + b_rnn).astype(jnp.float32)     # (VOCAB, H)
    whh_bf16 = whh.astype(jnp.bfloat16)                                  # bf16 MXU input
    return proj_tbl, whh_bf16, w_clf.astype(jnp.float32), b_clf.astype(jnp.float32)


# ----------------------------- model forward ---------------------------------
def model_forward(seq1, seq2, prepared):
    proj_tbl, whh_bf16, w_clf, b_clf = prepared

    full = lambda shape: pl.BlockSpec(shape, lambda: (0,) * len(shape))

    flops = (2 * (T * BP) * VOCAB * H          # one-hot projection matmul
             + 2 * (T - 1) * BP * H * H        # recurrence matmuls
             + 2 * B * (4 * H) * NUM_CLASSES)  # classifier
    bytes_accessed = (2 * T * B * 4 + VOCAB * H * 4 + H * H * 2
                      + 4 * H * NUM_CLASSES * 4 + NUM_CLASSES * 4
                      + B * NUM_CLASSES * 4)

    res_clf = pl.pallas_call(
        fused_model_kernel,
        out_shape=jax.ShapeDtypeStruct((B, NUM_CLASSES), jnp.float32),
        grid_spec=pltpu.PrefetchScalarGridSpec(
            num_scalar_prefetch=0,
            grid=(),
            in_specs=[
                full((T, B)),                  # seq1 token ids (time-major)
                full((T, B)),                  # seq2 token ids (time-major)
                full((VOCAB, H)),              # proj_tbl = emb @ Wih + b (pre-folded)
                full((H, H)),                  # Whh (bf16)
                full((4 * H, NUM_CLASSES)),    # classifier weight
                full((1, NUM_CLASSES)),        # classifier bias
            ],
            out_specs=full((B, NUM_CLASSES)),
        ),
        cost_estimate=pl.CostEstimate(flops=flops,
                                      transcendentals=T * BP * H,
                                      bytes_accessed=bytes_accessed),
    )(seq1, seq2, proj_tbl, whh_bf16, w_clf, b_clf)
    return {"res_clf": res_clf}


# ----------------------------- pure JAX reference ----------------------------
def ref_forward(seq1, seq2, params):
    emb_table, wih, whh, b_rnn, w_clf, b_clf = params

    def one(seq):
        mask = (seq == PADDING_IDX)
        lens = T - jnp.sum(mask.astype(jnp.int32), axis=0)
        embs = emb_table[seq]

        def step(h, x):
            h = jnp.tanh(x @ wih + h @ whh + b_rnn[0])
            return h, h

        _, out = lax.scan(step, jnp.zeros((B, H), jnp.float32), embs)
        return out[lens - 1, jnp.arange(B), :]

    r1, r2 = one(seq1), one(seq2)
    u = jnp.concatenate([r1, r2, r1 * r2, jnp.abs(r1 - r2)], axis=-1)
    return u @ w_clf + b_clf[0]


# ----------------------------- main ------------------------------------------
if __name__ == "__main__":
    key = jax.random.PRNGKey(0)
    k_emb, k_wih, k_whh, k_b, k_wclf, k_bclf, k_s1, k_s2 = jax.random.split(key, 8)

    # Deterministic parameter init (embedding row at padding_idx is zeroed).
    emb_table = jax.random.normal(k_emb, (VOCAB, H), jnp.float32) * 0.5
    emb_table = emb_table.at[PADDING_IDX].set(0.0)
    scale = 1.0 / np.sqrt(H)
    wih = jax.random.normal(k_wih, (H, H), jnp.float32) * scale
    whh = jax.random.normal(k_whh, (H, H), jnp.float32) * scale
    b_rnn = jax.random.normal(k_b, (1, H), jnp.float32) * 0.1
    w_clf = jax.random.normal(k_wclf, (4 * H, NUM_CLASSES), jnp.float32) * (1.0 / np.sqrt(4 * H))
    b_clf = jax.random.normal(k_bclf, (1, NUM_CLASSES), jnp.float32) * 0.1

    params = (emb_table, wih, whh, b_rnn, w_clf, b_clf)
    prepared = prepare_params(params)   # done once, reused across calls

    # Example sequences (time-major, int32), with trailing padding -> varied lens.
    seq1 = jax.random.randint(k_s1, (T, B), 1, VOCAB, dtype=jnp.int32)
    seq2 = jax.random.randint(k_s2, (T, B), 1, VOCAB, dtype=jnp.int32)
    seq1 = seq1.at[T - 2:, 0].set(PADDING_IDX)   # batch 0 of seq1: len = T-2
    seq1 = seq1.at[T - 1:, 1].set(PADDING_IDX)   # batch 1 of seq1: len = T-1
    seq2 = seq2.at[T - 3:, 1].set(PADDING_IDX)   # batch 1 of seq2: len = T-3

    out = model_forward(seq1, seq2, prepared)
    res = jax.block_until_ready(out["res_clf"])

    ref = jax.block_until_ready(ref_forward(seq1, seq2, params))
    # Tolerance loosened vs. the pure-f32 reference because the recurrence uses
    # bf16 MXU inputs (f32 accumulate) per the performance review; typical error
    # is ~1e-3, and genuine indexing/lens bugs would be O(0.1-1).
    np.testing.assert_allclose(np.asarray(res), np.asarray(ref), rtol=5e-2, atol=5e-2)

    print("KERNEL_OK")
</pallas_src>

<mosaic_0001>
module attributes {stable_mosaic.version = 11 : i64} {
  func.func @fused_model_kernel(%arg0: memref<8x2xi32, #tpu.memory_space<vmem>>, %arg1: memref<8x2xi32, #tpu.memory_space<vmem>>, %arg2: memref<16x32xf32, #tpu.memory_space<vmem>>, %arg3: memref<32x32xbf16, #tpu.memory_space<vmem>>, %arg4: memref<128x2xf32, #tpu.memory_space<vmem>>, %arg5: memref<1x2xf32, #tpu.memory_space<vmem>>, %arg6: memref<2x2xf32, #tpu.memory_space<vmem>>) attributes {dimension_semantics = [], scalar_prefetch = 0 : i64, scratch_operands = 0 : i64, tpu.core_type = #tpu.core_type<tc>} {
    %0 = tpu.iota {dimensions = array<i32: 1>} : vector<8x8xi32>
    %c0_i32 = arith.constant 0 : i32
    %1 = vector.broadcast %c0_i32 : i32 to vector<8x8xi32>
    %c0_i32_0 = arith.constant 0 : i32
    %2 = vector.broadcast %c0_i32_0 : i32 to vector<8x8xi32>
    %3 = arith.cmpi eq, %0, %2 : vector<8x8xi32>
    %c0 = arith.constant 0 : index
    %c0_1 = arith.constant 0 : index
    %4 = vector.load %arg0[%c0, %c0_1] : memref<8x2xi32, #tpu.memory_space<vmem>>, vector<8x1xi32>
    %5 = vector.shape_cast %4 : vector<8x1xi32> to vector<8x1xi32>
    %6 = vector.broadcast %5 : vector<8x1xi32> to vector<8x8xi32>
    %7 = arith.select %3, %6, %1 : vector<8x8xi1>, vector<8x8xi32>
    %c1_i32 = arith.constant 1 : i32
    %8 = vector.broadcast %c1_i32 : i32 to vector<8x8xi32>
    %9 = arith.cmpi eq, %0, %8 : vector<8x8xi32>
    %c0_2 = arith.constant 0 : index
    %c1 = arith.constant 1 : index
    %10 = vector.load %arg0[%c0_2, %c1] : memref<8x2xi32, #tpu.memory_space<vmem>>, vector<8x1xi32>
    %11 = vector.shape_cast %10 : vector<8x1xi32> to vector<8x1xi32>
    %12 = vector.broadcast %11 : vector<8x1xi32> to vector<8x8xi32>
    %13 = arith.select %9, %12, %7 : vector<8x8xi1>, vector<8x8xi32>
    %c2_i32 = arith.constant 2 : i32
    %14 = vector.broadcast %c2_i32 : i32 to vector<8x8xi32>
    %15 = arith.cmpi eq, %0, %14 : vector<8x8xi32>
    %c0_3 = arith.constant 0 : index
    %c0_4 = arith.constant 0 : index
    %16 = vector.load %arg1[%c0_3, %c0_4] : memref<8x2xi32, #tpu.memory_space<vmem>>, vector<8x1xi32>
    %17 = vector.shape_cast %16 : vector<8x1xi32> to vector<8x1xi32>
    %18 = vector.broadcast %17 : vector<8x1xi32> to vector<8x8xi32>
    %19 = arith.select %15, %18, %13 : vector<8x8xi1>, vector<8x8xi32>
    %c3_i32 = arith.constant 3 : i32
    %20 = vector.broadcast %c3_i32 : i32 to vector<8x8xi32>
    %21 = arith.cmpi eq, %0, %20 : vector<8x8xi32>
    %c0_5 = arith.constant 0 : index
    %c1_6 = arith.constant 1 : index
    %22 = vector.load %arg1[%c0_5, %c1_6] : memref<8x2xi32, #tpu.memory_space<vmem>>, vector<8x1xi32>
    %23 = vector.shape_cast %22 : vector<8x1xi32> to vector<8x1xi32>
    %24 = vector.broadcast %23 : vector<8x1xi32> to vector<8x8xi32>
    %25 = arith.select %21, %24, %19 : vector<8x8xi1>, vector<8x8xi32>
    %c0_i32_7 = arith.constant 0 : i32
    %26 = vector.broadcast %c0_i32_7 : i32 to vector<8x8xi32>
    %27 = arith.cmpi ne, %25, %26 : vector<8x8xi32>
    %28 = arith.extui %27 : vector<8x8xi1> to vector<8x8xi32>
    %cst = arith.constant dense<0> : vector<8xi32>
    %29 = vector.multi_reduction <add>, %28, %cst [0] : vector<8x8xi32> to vector<8xi32>
    %30 = vector.shape_cast %29 : vector<8xi32> to vector<1x8xi32>
    %31 = tpu.iota {dimensions = array<i32: 0>} : vector<8x8xi32>
    %c1_i32_8 = arith.constant 1 : i32
    %32 = vector.broadcast %c1_i32_8 : i32 to vector<8x8xi32>
    %33 = arith.addi %31, %32 : vector<8x8xi32>
    %34 = vector.broadcast %30 : vector<1x8xi32> to vector<8x8xi32>
    %35 = arith.cmpi eq, %33, %34 : vector<8x8xi32>
    %c8_i32 = arith.constant 8 : i32
    %36 = vector.broadcast %c8_i32 : i32 to vector<8x8xi32>
    %37 = arith.cmpi eq, %33, %36 : vector<8x8xi32>
    %c0_i32_9 = arith.constant 0 : i32
    %38 = vector.broadcast %c0_i32_9 : i32 to vector<1x8xi32>
    %39 = arith.cmpi eq, %30, %38 : vector<1x8xi32>
    %40 = vector.broadcast %39 : vector<1x8xi1> to vector<8x8xi1>
    %41 = arith.andi %37, %40 : vector<8x8xi1>
    %42 = arith.ori %35, %41 : vector<8x8xi1>
    %43 = arith.extui %42 : vector<8x8xi1> to vector<8x8xi32>
    %44 = arith.sitofp %43 : vector<8x8xi32> to vector<8x8xf32>
    %45 = tpu.transpose %44, [1, 0] : vector<8x8xf32> -> vector<8x8xf32>
    %46 = vector.shape_cast %25 : vector<8x8xi32> to vector<8x8x1xi32>
    %47 = tpu.iota {dimensions = array<i32: 2>} : vector<8x8x16xi32>
    %48 = vector.broadcast %46 : vector<8x8x1xi32> to vector<8x8x16xi32>
    %49 = arith.cmpi eq, %48, %47 : vector<8x8x16xi32>
    %50 = arith.extui %49 : vector<8x8x16xi1> to vector<8x8x16xi32>
    %51 = arith.sitofp %50 : vector<8x8x16xi32> to vector<8x8x16xf32>
    %52 = vector.shape_cast %51 : vector<8x8x16xf32> to vector<64x16xf32>
    %c0_10 = arith.constant 0 : index
    %c0_11 = arith.constant 0 : index
    %53 = vector.load %arg2[%c0_10, %c0_11] : memref<16x32xf32, #tpu.memory_space<vmem>>, vector<16x32xf32>
    %cst_12 = arith.constant dense<0.000000e+00> : vector<64x32xf32>
    %54 = tpu.matmul %52, %53, %cst_12 {dimension_numbers = #tpu.dot_dimension_numbers<[1], [0], [0], [1], [0, 0, 1, 1], [], []>} : vector<64x16xf32>, vector<16x32xf32>, vector<64x32xf32> -> vector<64x32xf32>
    %55 = vector.shape_cast %54 : vector<64x32xf32> to vector<8x8x32xf32>
    %c0_13 = arith.constant 0 : index
    %c0_14 = arith.constant 0 : index
    %56 = vector.load %arg3[%c0_13, %c0_14] : memref<32x32xbf16, #tpu.memory_space<vmem>>, vector<32x32xbf16>
    %57 = vector.extract_strided_slice %55 {offsets = [0, 0, 0], sizes = [1, 8, 32], strides = [1, 1, 1]} : vector<8x8x32xf32> to vector<1x8x32xf32>
    %58 = vector.shape_cast %57 : vector<1x8x32xf32> to vector<8x32xf32>
    %59 = math.tanh %58 : vector<8x32xf32>
    %60 = vector.extract_strided_slice %45 {offsets = [0, 0], sizes = [8, 1], strides = [1, 1]} : vector<8x8xf32> to vector<8x1xf32>
    %61 = vector.broadcast %60 : vector<8x1xf32> to vector<8x32xf32>
    %62 = arith.mulf %61, %59 : vector<8x32xf32>
    %63 = vector.extract_strided_slice %55 {offsets = [1, 0, 0], sizes = [1, 8, 32], strides = [1, 1, 1]} : vector<8x8x32xf32> to vector<1x8x32xf32>
    %64 = vector.shape_cast %63 : vector<1x8x32xf32> to vector<8x32xf32>
    %65 = arith.truncf %59 : vector<8x32xf32> to vector<8x32xbf16>
    %cst_15 = arith.constant dense<0.000000e+00> : vector<8x32xf32>
    %66 = tpu.matmul %65, %56, %cst_15 {dimension_numbers = #tpu.dot_dimension_numbers<[1], [0], [0], [1], [0, 0, 1, 1], [], []>} : vector<8x32xbf16>, vector<32x32xbf16>, vector<8x32xf32> -> vector<8x32xf32>
    %67 = arith.addf %64, %66 : vector<8x32xf32>
    %68 = math.tanh %67 : vector<8x32xf32>
    %69 = vector.extract_strided_slice %45 {offsets = [0, 1], sizes = [8, 1], strides = [1, 1]} : vector<8x8xf32> to vector<8x1xf32>
    %70 = vector.broadcast %69 : vector<8x1xf32> to vector<8x32xf32>
    %71 = arith.mulf %70, %68 : vector<8x32xf32>
    %72 = arith.addf %62, %71 : vector<8x32xf32>
    %73 = vector.extract_strided_slice %55 {offsets = [2, 0, 0], sizes = [1, 8, 32], strides = [1, 1, 1]} : vector<8x8x32xf32> to vector<1x8x32xf32>
    %74 = vector.shape_cast %73 : vector<1x8x32xf32> to vector<8x32xf32>
    %75 = arith.truncf %68 : vector<8x32xf32> to vector<8x32xbf16>
    %cst_16 = arith.constant dense<0.000000e+00> : vector<8x32xf32>
    %76 = tpu.matmul %75, %56, %cst_16 {dimension_numbers = #tpu.dot_dimension_numbers<[1], [0], [0], [1], [0, 0, 1, 1], [], []>} : vector<8x32xbf16>, vector<32x32xbf16>, vector<8x32xf32> -> vector<8x32xf32>
    %77 = arith.addf %74, %76 : vector<8x32xf32>
    %78 = math.tanh %77 : vector<8x32xf32>
    %79 = vector.extract_strided_slice %45 {offsets = [0, 2], sizes = [8, 1], strides = [1, 1]} : vector<8x8xf32> to vector<8x1xf32>
    %80 = vector.broadcast %79 : vector<8x1xf32> to vector<8x32xf32>
    %81 = arith.mulf %80, %78 : vector<8x32xf32>
    %82 = arith.addf %72, %81 : vector<8x32xf32>
    %83 = vector.extract_strided_slice %55 {offsets = [3, 0, 0], sizes = [1, 8, 32], strides = [1, 1, 1]} : vector<8x8x32xf32> to vector<1x8x32xf32>
    %84 = vector.shape_cast %83 : vector<1x8x32xf32> to vector<8x32xf32>
    %85 = arith.truncf %78 : vector<8x32xf32> to vector<8x32xbf16>
    %cst_17 = arith.constant dense<0.000000e+00> : vector<8x32xf32>
    %86 = tpu.matmul %85, %56, %cst_17 {dimension_numbers = #tpu.dot_dimension_numbers<[1], [0], [0], [1], [0, 0, 1, 1], [], []>} : vector<8x32xbf16>, vector<32x32xbf16>, vector<8x32xf32> -> vector<8x32xf32>
    %87 = arith.addf %84, %86 : vector<8x32xf32>
    %88 = math.tanh %87 : vector<8x32xf32>
    %89 = vector.extract_strided_slice %45 {offsets = [0, 3], sizes = [8, 1], strides = [1, 1]} : vector<8x8xf32> to vector<8x1xf32>
    %90 = vector.broadcast %89 : vector<8x1xf32> to vector<8x32xf32>
    %91 = arith.mulf %90, %88 : vector<8x32xf32>
    %92 = arith.addf %82, %91 : vector<8x32xf32>
    %93 = vector.extract_strided_slice %55 {offsets = [4, 0, 0], sizes = [1, 8, 32], strides = [1, 1, 1]} : vector<8x8x32xf32> to vector<1x8x32xf32>
    %94 = vector.shape_cast %93 : vector<1x8x32xf32> to vector<8x32xf32>
    %95 = arith.truncf %88 : vector<8x32xf32> to vector<8x32xbf16>
    %cst_18 = arith.constant dense<0.000000e+00> : vector<8x32xf32>
    %96 = tpu.matmul %95, %56, %cst_18 {dimension_numbers = #tpu.dot_dimension_numbers<[1], [0], [0], [1], [0, 0, 1, 1], [], []>} : vector<8x32xbf16>, vector<32x32xbf16>, vector<8x32xf32> -> vector<8x32xf32>
    %97 = arith.addf %94, %96 : vector<8x32xf32>
    %98 = math.tanh %97 : vector<8x32xf32>
    %99 = vector.extract_strided_slice %45 {offsets = [0, 4], sizes = [8, 1], strides = [1, 1]} : vector<8x8xf32> to vector<8x1xf32>
    %100 = vector.broadcast %99 : vector<8x1xf32> to vector<8x32xf32>
    %101 = arith.mulf %100, %98 : vector<8x32xf32>
    %102 = arith.addf %92, %101 : vector<8x32xf32>
    %103 = vector.extract_strided_slice %55 {offsets = [5, 0, 0], sizes = [1, 8, 32], strides = [1, 1, 1]} : vector<8x8x32xf32> to vector<1x8x32xf32>
    %104 = vector.shape_cast %103 : vector<1x8x32xf32> to vector<8x32xf32>
    %105 = arith.truncf %98 : vector<8x32xf32> to vector<8x32xbf16>
    %cst_19 = arith.constant dense<0.000000e+00> : vector<8x32xf32>
    %106 = tpu.matmul %105, %56, %cst_19 {dimension_numbers = #tpu.dot_dimension_numbers<[1], [0], [0], [1], [0, 0, 1, 1], [], []>} : vector<8x32xbf16>, vector<32x32xbf16>, vector<8x32xf32> -> vector<8x32xf32>
    %107 = arith.addf %104, %106 : vector<8x32xf32>
    %108 = math.tanh %107 : vector<8x32xf32>
    %109 = vector.extract_strided_slice %45 {offsets = [0, 5], sizes = [8, 1], strides = [1, 1]} : vector<8x8xf32> to vector<8x1xf32>
    %110 = vector.broadcast %109 : vector<8x1xf32> to vector<8x32xf32>
    %111 = arith.mulf %110, %108 : vector<8x32xf32>
    %112 = arith.addf %102, %111 : vector<8x32xf32>
    %113 = vector.extract_strided_slice %55 {offsets = [6, 0, 0], sizes = [1, 8, 32], strides = [1, 1, 1]} : vector<8x8x32xf32> to vector<1x8x32xf32>
    %114 = vector.shape_cast %113 : vector<1x8x32xf32> to vector<8x32xf32>
    %115 = arith.truncf %108 : vector<8x32xf32> to vector<8x32xbf16>
    %cst_20 = arith.constant dense<0.000000e+00> : vector<8x32xf32>
    %116 = tpu.matmul %115, %56, %cst_20 {dimension_numbers = #tpu.dot_dimension_numbers<[1], [0], [0], [1], [0, 0, 1, 1], [], []>} : vector<8x32xbf16>, vector<32x32xbf16>, vector<8x32xf32> -> vector<8x32xf32>
    %117 = arith.addf %114, %116 : vector<8x32xf32>
    %118 = math.tanh %117 : vector<8x32xf32>
    %119 = vector.extract_strided_slice %45 {offsets = [0, 6], sizes = [8, 1], strides = [1, 1]} : vector<8x8xf32> to vector<8x1xf32>
    %120 = vector.broadcast %119 : vector<8x1xf32> to vector<8x32xf32>
    %121 = arith.mulf %120, %118 : vector<8x32xf32>
    %122 = arith.addf %112, %121 : vector<8x32xf32>
    %123 = vector.extract_strided_slice %55 {offsets = [7, 0, 0], sizes = [1, 8, 32], strides = [1, 1, 1]} : vector<8x8x32xf32> to vector<1x8x32xf32>
    %124 = vector.shape_cast %123 : vector<1x8x32xf32> to vector<8x32xf32>
    %125 = arith.truncf %118 : vector<8x32xf32> to vector<8x32xbf16>
    %cst_21 = arith.constant dense<0.000000e+00> : vector<8x32xf32>
    %126 = tpu.matmul %125, %56, %cst_21 {dimension_numbers = #tpu.dot_dimension_numbers<[1], [0], [0], [1], [0, 0, 1, 1], [], []>} : vector<8x32xbf16>, vector<32x32xbf16>, vector<8x32xf32> -> vector<8x32xf32>
    %127 = arith.addf %124, %126 : vector<8x32xf32>
    %128 = math.tanh %127 : vector<8x32xf32>
    %129 = vector.extract_strided_slice %45 {offsets = [0, 7], sizes = [8, 1], strides = [1, 1]} : vector<8x8xf32> to vector<8x1xf32>
    %130 = vector.broadcast %129 : vector<8x1xf32> to vector<8x32xf32>
    %131 = arith.mulf %130, %128 : vector<8x32xf32>
    %132 = arith.addf %122, %131 : vector<8x32xf32>
    %133 = vector.extract_strided_slice %132 {offsets = [0, 0], sizes = [2, 32], strides = [1, 1]} : vector<8x32xf32> to vector<2x32xf32>
    %134 = vector.extract_strided_slice %132 {offsets = [2, 0], sizes = [2, 32], strides = [1, 1]} : vector<8x32xf32> to vector<2x32xf32>
    %135 = arith.mulf %133, %134 : vector<2x32xf32>
    %136 = arith.subf %133, %134 : vector<2x32xf32>
    %137 = math.absf %136 : vector<2x32xf32>
    %138 = tpu.concatenate %133, %134, %135, %137 in 1 : vector<2x32xf32>, vector<2x32xf32>, vector<2x32xf32>, vector<2x32xf32> -> vector<2x128xf32>
    %c0_22 = arith.constant 0 : index
    %c0_23 = arith.constant 0 : index
    %139 = vector.load %arg4[%c0_22, %c0_23] : memref<128x2xf32, #tpu.memory_space<vmem>>, vector<128x2xf32>
    %cst_24 = arith.constant dense<0.000000e+00> : vector<2x2xf32>
    %140 = tpu.matmul %138, %139, %cst_24 {dimension_numbers = #tpu.dot_dimension_numbers<[1], [0], [0], [1], [0, 0, 1, 1], [], []>} : vector<2x128xf32>, vector<128x2xf32>, vector<2x2xf32> -> vector<2x2xf32>
    %c0_25 = arith.constant 0 : index
    %c0_26 = arith.constant 0 : index
    %141 = vector.load %arg5[%c0_25, %c0_26] : memref<1x2xf32, #tpu.memory_space<vmem>>, vector<1x2xf32>
    %142 = vector.broadcast %141 : vector<1x2xf32> to vector<2x2xf32>
    %143 = arith.addf %140, %142 : vector<2x2xf32>
    %c0_27 = arith.constant 0 : index
    %c0_28 = arith.constant 0 : index
    %144 = vector.load %arg6[%c0_27, %c0_28] : memref<2x2xf32, #tpu.memory_space<vmem>>, vector<2x2xf32>
    tpu.vector_store %arg6[%c0_27, %c0_28], %143 {strides = array<i32>} : memref<2x2xf32, #tpu.memory_space<vmem>>, vector<2x2xf32>,
    return
  }
}

</mosaic_0001>

<bundles_post_ra>
// kernel: tpu_custom_call.1
= control target key start
LH: loop header
LB: loop body
LE: loop exit
PB: predicated region body
PF: predicated region fallthrough
CT: control target
= control target key end

     0   :  { %v637_v2 = vmov 0   ;;  %s800_s0 = inlined_call_operand.vmem [shape: s32[8,2], index: 0, kind: input, shape index: {}]   ;;  %s801_s1 = inlined_call_operand.vmem [shape: s32[8,2], index: 1, kind: input, shape index: {}]   ;;  %s802_s2 = inlined_call_operand.vmem [shape: f32[16,32], index: 2, kind: input, shape index: {}]   ;;  %s803_s3 = inlined_call_operand.vmem [shape: bf16[32,32], index: 3, kind: input, shape index: {}]   ;;  %s804_s4 = inlined_call_operand.vmem [shape: f32[128,2], index: 4, kind: input, shape index: {}]   ;;  %s805_s5 = inlined_call_operand.vmem [shape: f32[1,2], index: 5, kind: input, shape index: {}]   ;;  %s806_s6 = inlined_call_operand.hbm [shape: f32[2,2], index: 6, kind: output, shape index: {}]  }
   0x1   :  { %v28_v0 = vld [vmem:[%s800_s0] sm:$0xff]  ;;  %579 = vset.pattern.permute.xlu0 %v637_v2  ;;  %581 = vset.pattern.permute.xlu1 %v637_v2 }
   0x2   :  { %v39_v1 = vld [vmem:[%s801_s1] sm:$0xff] }
   0x3   :  { %11 = vsyncpa [#allocation3], 0  ;;  %30 = vperm.xlu0 %579, %v28_v0   ;;  %41 = vperm.xlu1 %581, %v39_v1   ;;  %v638_v3 = vmov 1   ;;  %v25_v4 = vlaneseq  ;;  %vm51_vm5 = vcmask 64512   ;;  %v184_v26 = vld [vmem:[%s802_s2 + $0x8] sm:$0xff]  ;;  %v183_v33 = vld [vmem:[%s802_s2] sm:$0xff] }
   0x4   :  { %224 = vmatpush.msra.mxu0 %v184_v26  ;;  %564 = vmatpush.msra.mxu3 %v184_v26  ;;  %v639_v34 = vmov 0.0   ;;  %vm185_vm11 = vcmask 130048   ;;  %v563_v52 = vld [vmem:[%s803_s3 + $0x8] sm:$0xff]  ;;  %v562_v53 = vld [vmem:[%s803_s3] sm:$0xff]  ;;  %v640_v58 = vmov 2   ;;  %s646_s25 = smov 32  }
   0x5   :  { %v60_v5 = vshrl.u32 %v25_v4, 7  ;;  %v691_v8 = vand.u32 127, %v25_v4  ;;  %285 = vmatpush.bf16.msra.mxu1 %v563_v52  ;;  %385 = vmatpush.bf16.msra.mxu2 %v563_v52  ;;  %s647_s26 = smov 96   ;;  %s648_s2 = smov 64  }
   0x6   :  { %225 = vmatpush.msra.mxu0 %v183_v33  ;;  %565 = vmatpush.msra.mxu3 %v183_v33  ;;  %s649_s14 = smov [#allocation2]  }
   0x7   :  { %583 = vset.pattern.permute.xlu2 %v60_v5  ;;  %vm27_vm0 = vcmp.eq.s32.totalorder %v691_v8, 0  ;;  %vm33_vm1 = vcmp.eq.s32.totalorder %v691_v8, 1  ;;  %vm38_vm2 = vcmp.eq.s32.totalorder %v691_v8, 2  ;;  %vm44_vm3 = vcmp.eq.s32.totalorder %v691_v8, 3  ;;  %s519_s15 = sshll.u32 %s649_s14, 4  ;;  %s520_s15 = int_to_ptr.vmem [resolvable:$true] %s519_s15 }
   0x8   :  { %v61_v32 = vadd.s32 1, %v60_v5  ;;  %310 = vmatpush.bf16.msrb.mxu3 %v563_v52 }
   0x9   :  { %286 = vmatpush.bf16.msra.mxu1 %v562_v53  ;;  %386 = vmatpush.bf16.msra.mxu2 %v562_v53 }
   0xa   :  { %vm63_vm6 = vcmp.eq.s32.totalorder %v61_v32, 8 }
   0xb   :  { %580 = vset.pattern.permute.xlu0 %v638_v3  ;;  %582 = vset.pattern.permute.xlu1 %v638_v3 }
   0xc   :  { %35 = vperm.xlu0 %580, %v28_v0   ;;  %46 = vperm.xlu1 %582, %v39_v1   ;;  %v641_v1 = vmov 3  }
   0xd   :  { %311 = vmatpush.bf16.msrb.mxu3 %v562_v53  ;;  %360 = vmatpush.bf16.msrb.mxu1 %v563_v52 }
  0x11   :  { %361 = vmatpush.bf16.msrb.mxu1 %v562_v53 }
  0x14   :  { %585 = vset.pattern.permute.xlu0 %v60_v5  ;;  %584 = vset.pattern.permute.xlu1 %v60_v5 }
  0x75   :  { %v31_v6 = vpop.permute.xlu0 %30  ;;  %v42_v7 = vpop.permute.xlu1 %41 }
  0x76   :  { %v32_v9 = vsel %vm27_vm0, %v31_v6, 0 }
  0x7e   :  { %v36_v10 = vpop.permute.xlu0 %35  ;;  %v47_v11 = vpop.permute.xlu1 %46 }
  0x7f   :  { %v37_v12 = vsel %vm33_vm1, %v36_v10, %v32_v9 }
  0x80   :  { %v43_v13 = vsel %vm38_vm2, %v42_v7, %v37_v12 }
  0x81   :  { %v48_v14 = vsel %vm44_vm3, %v47_v11, %v43_v13 }
  0x82   :  { %v152_v15 = vperm.slane %v48_v14, 7  ;;  %v124_v16 = vperm.slane %v48_v14, 3  ;;  %v103_v17 = vperm.slane %v48_v14, 0  ;;  %v131_v18 = vperm.slane %v48_v14, 4 }
  0x83   :  { %v110_v19 = vperm.slane %v48_v14, 1  ;;  %v145_v20 = vperm.slane %v48_v14, 6  ;;  %v117_v21 = vperm.slane %v48_v14, 2  ;;  %vm49_vm4 = vcmp.ne.s32.totalorder %v48_v14, 0 }
  0x84   :  { %157 = vperm.xlu1 %584, %v152_v15   ;;  %129 = vperm.xlu0 %585, %v124_v16   ;;  %v138_v22 = vperm.slane %v48_v14, 5  ;;  %v50_v23 = vsel %vm49_vm4, 1, %v637_v2  ;;  %vm275_vm4 = vcmask 261120  }
  0x85   :  { %108 = vperm.xlu2 %583, %v103_v17   ;;  %v52_v24 = vsel %vm51_vm5, %v50_v23, 0  ;;  %v642_v17 = vmov 4   ;;  %vm468_vm5 = vcmask 523264  }
  0x86   :  { %v53_v25 = vrot.slane %v52_v24, 4 }
  0x88   :  { %v54_v27 = vadd.s32 %v53_v25, %v52_v24 }
  0x8a   :  { %v55_v28 = vrot.slane %v54_v27, 2 }
  0x8c   :  { %136 = vperm.xlu1 %584, %v131_v18   ;;  %586 = vset.pattern.permute.xlu0 %v637_v2  ;;  %v56_v29 = vadd.s32 %v55_v28, %v54_v27  ;;  %v643_v27 = vmov 5  }
  0x8d   :  { %115 = vperm.xlu2 %583, %v110_v19  }
  0x8e   :  { %v57_v30 = vrot.slane %v56_v29, 1 }
  0x90   :  { %v58_v31 = vadd.s32 %v57_v30, %v56_v29 }
  0x92   :  { %vm64_vm7 = vcmp.eq.s32.totalorder %v58_v31, 0  ;;  %vm62_vm8 = vcmp.eq.s32.totalorder %v61_v32, %v58_v31 }
  0x93   :  { %vm67_vm9 = vmand %vm63_vm6, %vm64_vm7  ;;  %vm470_vm6 = vcmask 785408   ;;  %vm512_vm7 = vcmask 9216  }
  0x94   :  { %150 = vperm.xlu1 %584, %v145_v20   ;;  %vm68_vm10 = vmor %vm62_vm8, %vm67_vm9 }
  0x95   :  { %122 = vperm.xlu2 %583, %v117_v21   ;;  %v530_v35 = vsel %vm68_vm10, 1.0, %v639_v34 }
  0x9c   :  { %587 = vset.pattern.permute.xlu1 %v638_v3 }
  0x9d   :  { %143 = vperm.xlu2 %583, %v138_v22  }
  0xc3   :  { %71 = vxpose.xlu2.b32.start.end [1/1] (short) (narrow) %v530_v35, 8 }
  0xdf   :  { %v109_v36 = vpop.permute.xlu2 %108 }
  0xe0   :  { %vm159_vm12 = vcmp.eq.s32.totalorder %v109_v36, %v691_v8 }
  0xe1   :  { %v531_v37 = vsel %vm159_vm12, 1.0, %v639_v34 }
  0xe2   :  { %539 = vmatmul.msk.f32.vlgmr.msra.gmra.mxu0 %vm185_vm11, %v531_v37  ;;  %v644_v37 = vmov 6  }
  0xe7   :  { %v116_v38 = vpop.permute.xlu2 %115 }
  0xe8   :  { %vm160_vm13 = vcmp.eq.s32.totalorder %v116_v38, %v691_v8 }
  0xe9   :  { %v532_v39 = vsel %vm160_vm13, 1.0, %v639_v34 }
  0xea   :  { %540 = vmatmul.msk.f32.gmra.mxu0 %vm185_vm11, %v532_v39 }
  0xef   :  { %v123_v40 = vpop.permute.xlu2 %122 }
  0xf0   :  { %vm161_vm14 = vcmp.eq.s32.totalorder %v123_v40, %v691_v8 }
  0xf1   :  { %v533_v41 = vsel %vm161_vm14, 1.0, %v639_v34 }
  0xf2   :  { %541 = vmatmul.msk.f32.gmra.mxu0 %vm185_vm11, %v533_v41 }
  0xf6   :  { %v158_v42 = vpop.permute.xlu1 %157  ;;  %v130_v43 = vpop.permute.xlu0 %129 }
  0xf7   :  { %vm166_vm15 = vcmp.eq.s32.totalorder %v158_v42, %v691_v8  ;;  %vm162_vm0 = vcmp.eq.s32.totalorder %v130_v43, %v691_v8  ;;  %v144_v48 = vpop.permute.xlu2 %143 }
  0xf8   :  { %v538_v44 = vsel %vm166_vm15, 1.0, %v639_v34  ;;  %v534_v45 = vsel %vm162_vm0, 1.0, %v639_v34  ;;  %vm164_vm2 = vcmp.eq.s32.totalorder %v144_v48, %v691_v8 }
  0xf9   :  { %546 = vmatmul.msk.f32.vlgmr.msra.gmra.mxu3 %vm185_vm11, %v538_v44  ;;  %v536_v49 = vsel %vm164_vm2, 1.0, %v639_v34 }
  0xfa   :  { %542 = vmatmul.msk.f32.gmra.mxu0 %vm185_vm11, %v534_v45  ;;  %335 = vmatpush.bf16.msra.mxu3 %v563_v52 }
  0xfe   :  { %v137_v46 = vpop.permute.xlu1 %136  ;;  %336 = vmatpush.bf16.msra.mxu3 %v562_v53 }
  0xff   :  { %vm163_vm1 = vcmp.eq.s32.totalorder %v137_v46, %v691_v8 }
 0x100   :  { %v535_v47 = vsel %vm163_vm1, 1.0, %v639_v34 }
 0x102   :  { %543 = vmatmul.msk.f32.gmra.mxu0 %vm185_vm11, %v535_v47  ;;  %v645_v47 = vmov 7  }
 0x106   :  { %v151_v50 = vpop.permute.xlu1 %150 }
 0x107   :  { %vm165_vm3 = vcmp.eq.s32.totalorder %v151_v50, %v691_v8 }
 0x108   :  { %v537_v51 = vsel %vm165_vm3, 1.0, %v639_v34 }
 0x10a   :  { %544 = vmatmul.msk.f32.gmra.mxu0 %vm185_vm11, %v536_v49 }
 0x112   :  { %545 = vmatmul.msk.f32.gmra.mxu0 %vm185_vm11, %v537_v51 }
 0x125   :  { %592 = vset.pattern.permute.xlu2 %v644_v37 }
 0x15c   :  { %v725_v54 = vpop.trf.xlu2 }
 0x15d   :  { %258 = vperm.xlu0 %586, %v725_v54   ;;  %295 = vperm.xlu1 %587, %v725_v54  }
 0x15e   :  { %420 = vperm.xlu2 %592, %v725_v54  }
 0x15f   :  { %v227_v55 = vpop.f32.mrf.mxu0 }
 0x160   :  { %595 = vtanh.f32 %v227_v55 }
 0x165   :  { %588 = vset.pattern.permute.xlu1 %v640_v58  ;;  %589 = vset.pattern.permute.xlu0 %v641_v1  ;;  %v487_v58 = vld [vmem:[%s804_s4 + $0x78] sm:$0xff]  ;;  %v481_v1 = vld [vmem:[%s804_s4 + $0x48] sm:$0xff] }
 0x166   :  { %v596_v56 = vpop.eup %595  ;;  %320 = vperm.xlu1 %588, %v725_v54   ;;  %345 = vperm.xlu0 %589, %v725_v54  }
 0x167   :  { %v262_v57 = vpack.c.bf16 %v596_v56, %v596_v56  ;;  %v230_v59 = vpop.f32.mrf.mxu0  ;;  %492 = vmatpush.msrb.mxu2 %v487_v58 }
 0x169   :  { %555 = vmatmul.msk.bf16.vlgmr.msra.gmra.mxu1 %vm275_vm4, %v262_v57 }
 0x16a   :  { %435 = vmatpush.bf16.msra.mxu1 %v563_v52 }
 0x16e   :  { %436 = vmatpush.bf16.msra.mxu1 %v562_v53  ;;  %590 = vset.pattern.permute.xlu1 %v642_v17  ;;  %v474_v17 = vld [vmem:[%s804_s4 + $0x10] sm:$0xff] }
 0x16f   :  { %v233_v4 = vpop.f32.mrf.mxu0  ;;  %370 = vperm.xlu1 %590, %v725_v54   ;;  %593 = vset.pattern.permute.xlu0 %v645_v47 }
 0x170   :  { %445 = vperm.xlu0 %593, %v725_v54  }
 0x177   :  { %v236_v18 = vpop.f32.mrf.mxu0  ;;  %591 = vset.pattern.permute.xlu1 %v643_v27 }
 0x178   :  { %395 = vperm.xlu1 %591, %v725_v54   ;;  %v486_v54 = vld [vmem:[%s804_s4 + $0x70] sm:$0xff] }
 0x179   :  { %493 = vmatpush.msrb.mxu2 %v486_v54 }
 0x17c   :  { %v733_v2 = vpop.f32.mrf.mxu3 }
 0x17f   :  { %v239_v28 = vpop.f32.mrf.mxu0 }
 0x187   :  { %v242_v38 = vpop.f32.mrf.mxu0 }
 0x18f   :  { %v245_v48 = vpop.f32.mrf.mxu0 }
 0x1b8   :  { %v421_v51 = vpop.permute.xlu2 %420 }
 0x1cf   :  { %v296_v3 = vpop.permute.xlu1 %295  ;;  %v259_v7 = vpop.permute.xlu0 %258 }
 0x1d0   :  { %v261_v10 = vmul.f32 %v596_v56, %v259_v7 }
 0x1d8   :  { %v321_v9 = vpop.permute.xlu1 %320  ;;  %v346_v21 = vpop.permute.xlu0 %345 }
 0x1e1   :  { %v371_v31 = vpop.permute.xlu1 %370 }
 0x1e2   :  { %v446_v7 = vpop.permute.xlu0 %445 }
 0x1e6   :  { %v288_v60 = vpop.f32.mrf.mxu1 }
 0x1e7   :  { %v292_v61 = vadd.f32 %v288_v60, %v230_v59  ;;  %v485_v59 = vld [vmem:[%s804_s4 + $0x68] sm:$0xff]  ;;  %v484_v60 = vld [vmem:[%s804_s4 + $0x60] sm:$0xff] }
 0x1e8   :  { %494 = vmatpush.msrb.mxu2 %v485_v59 }
 0x1e9   :  { %597 = vtanh.f32 %v292_v61  ;;  %v483_v61 = vld [vmem:[%s804_s4 + $0x58] sm:$0xff] }
 0x1ea   :  { %v396_v41 = vpop.permute.xlu1 %395  ;;  %495 = vmatpush.msrb.mxu2 %v484_v60 }
 0x1ec   :  { %496 = vmatpush.msrb.mxu2 %v483_v61 }
 0x1ee   :  { %v290_v62 = vpop.f32.mrf.mxu1 }
 0x1ef   :  { %v598_v63 = vpop.eup %597 }
 0x1f0   :  { %v300_v0 = vpack.c.bf16 %v598_v63, %v598_v63  ;;  %v298_v8 = vmul.f32 %v598_v63, %v296_v3  ;;  %v482_v63 = vld [vmem:[%s804_s4 + $0x50] sm:$0xff]  ;;  %v480_v3 = vld [vmem:[%s804_s4 + $0x40] sm:$0xff] }
 0x1f1   :  { %497 = vmatpush.msrb.mxu2 %v482_v63 }
 0x1f2   :  { %556 = vmatmul.msk.bf16.vlgmr.msrb.gmra.mxu3 %vm275_vm4, %v300_v0  ;;  %v299_v13 = vadd.f32 %v298_v8, %v261_v10 }
 0x1f3   :  { %410 = vmatpush.bf16.msrb.mxu3 %v563_v52  ;;  %498 = vmatpush.msrb.mxu2 %v481_v1 }
 0x1f5   :  { %499 = vmatpush.msrb.mxu2 %v480_v3 }
 0x1f7   :  { %411 = vmatpush.bf16.msrb.mxu3 %v562_v53 }
 0x275   :  { %v313_v5 = vpop.f32.mrf.mxu3 }
 0x276   :  { %v317_v6 = vadd.f32 %v313_v5, %v233_v4  ;;  %v479_v4 = vld [vmem:[%s804_s4 + $0x38] sm:$0xff] }
 0x277   :  { %500 = vmatpush.msrb.mxu2 %v479_v4 }
 0x278   :  { %599 = vtanh.f32 %v317_v6 }
 0x27d   :  { %v315_v11 = vpop.f32.mrf.mxu3 }
 0x27e   :  { %v600_v12 = vpop.eup %599 }
 0x27f   :  { %v325_v14 = vpack.c.bf16 %v600_v12, %v600_v12  ;;  %v323_v15 = vmul.f32 %v600_v12, %v321_v9  ;;  %v477_v9 = vld [vmem:[%s804_s4 + $0x28] sm:$0xff] }
 0x281   :  { %v324_v16 = vadd.f32 %v323_v15, %v299_v13  ;;  %557 = vmatmul.msk.bf16.vlgmr.msra.gmra.mxu3 %vm275_vm4, %v325_v14  ;;  %v476_v15 = vld [vmem:[%s804_s4 + $0x20] sm:$0xff] }
 0x304   :  { %v338_v19 = vpop.f32.mrf.mxu3 }
 0x305   :  { %v342_v20 = vadd.f32 %v338_v19, %v236_v18  ;;  %v473_v18 = vld [vmem:[%s804_s4 + $0x8] sm:$0xff]  ;;  %v472_v19 = vld [vmem:[%s804_s4] sm:$0xff] }
 0x307   :  { %601 = vtanh.f32 %v342_v20 }
 0x30c   :  { %v340_v22 = vpop.f32.mrf.mxu3 }
 0x30d   :  { %v602_v23 = vpop.eup %601 }
 0x30e   :  { %v348_v24 = vmul.f32 %v602_v23, %v346_v21  ;;  %v350_v25 = vpack.c.bf16 %v602_v23, %v602_v23 }
 0x310   :  { %v349_v26 = vadd.f32 %v348_v24, %v324_v16  ;;  %558 = vmatmul.msk.bf16.vlgmr.msrb.gmra.mxu1 %vm275_vm4, %v350_v25  ;;  %v475_v16 = vld [vmem:[%s804_s4 + $0x18] sm:$0xff] }
 0x38d   :  { %v363_v29 = vpop.f32.mrf.mxu1 }
 0x38e   :  { %v367_v30 = vadd.f32 %v363_v29, %v239_v28 }
 0x390   :  { %603 = vtanh.f32 %v367_v30 }
 0x395   :  { %v365_v32 = vpop.f32.mrf.mxu1 }
 0x396   :  { %v604_v33 = vpop.eup %603 }
 0x397   :  { %v373_v34 = vmul.f32 %v604_v33, %v371_v31  ;;  %v375_v35 = vpack.c.bf16 %v604_v33, %v604_v33 }
 0x399   :  { %v374_v36 = vadd.f32 %v373_v34, %v349_v26  ;;  %559 = vmatmul.msk.bf16.vlgmr.msra.gmra.mxu2 %vm275_vm4, %v375_v35  ;;  %v594_v26 = vld [vmem:[%s805_s5] ss:$0 sm:$0xff] }
 0x41c   :  { %v388_v39 = vpop.f32.mrf.mxu2 }
 0x41d   :  { %v392_v40 = vadd.f32 %v388_v39, %v242_v38 }
 0x41f   :  { %605 = vtanh.f32 %v392_v40 }
 0x424   :  { %v390_v42 = vpop.f32.mrf.mxu2 }
 0x425   :  { %v606_v43 = vpop.eup %605 }
 0x426   :  { %v400_v44 = vpack.c.bf16 %v606_v43, %v606_v43  ;;  %v398_v45 = vmul.f32 %v606_v43, %v396_v41 }
 0x428   :  { %v399_v46 = vadd.f32 %v398_v45, %v374_v36  ;;  %560 = vmatmul.msk.bf16.vlgmr.msrb.gmra.mxu3 %vm275_vm4, %v400_v44 }
 0x4ab   :  { %v413_v49 = vpop.f32.mrf.mxu3 }
 0x4ac   :  { %v417_v50 = vadd.f32 %v413_v49, %v245_v48 }
 0x4ae   :  { %607 = vtanh.f32 %v417_v50 }
 0x4b3   :  { %v415_v52 = vpop.f32.mrf.mxu3 }
 0x4b4   :  { %v608_v53 = vpop.eup %607 }
 0x4b5   :  { %v425_v55 = vpack.c.bf16 %v608_v53, %v608_v53  ;;  %v423_v56 = vmul.f32 %v608_v53, %v421_v51 }
 0x4b7   :  { %v424_v57 = vadd.f32 %v423_v56, %v399_v46  ;;  %561 = vmatmul.msk.bf16.vlgmr.msra.gmra.mxu1 %vm275_vm4, %v425_v55 }
 0x534   :  { %v438_v62 = vpop.f32.mrf.mxu1 }
 0x535   :  { %v442_v0 = vadd.f32 %v438_v62, %v733_v2  ;;  %v478_v2 = vld [vmem:[%s804_s4 + $0x30] sm:$0xff]  ;;  %s521_s4 = sshll.u32 %s806_s6, 4  ;;  %s522_s4 = int_to_ptr.hbm [resolvable:$true] %s521_s4 }
 0x536   :  { %501 = vmatpush.msrb.mxu2 %v478_v2 }
 0x537   :  { %609 = vtanh.f32 %v442_v0 }
 0x538   :  { %502 = vmatpush.msrb.mxu2 %v477_v9 }
 0x53a   :  { %503 = vmatpush.msrb.mxu2 %v476_v15 }
 0x53c   :  { %v440_v5 = vpop.f32.mrf.mxu1  ;;  %504 = vmatpush.msrb.mxu2 %v475_v16 }
 0x53d   :  { %v610_v6 = vpop.eup %609 }
 0x53e   :  { %v448_v8 = vmul.f32 %v610_v6, %v446_v7  ;;  %505 = vmatpush.msrb.mxu2 %v474_v17 }
 0x540   :  { %v449_v10 = vadd.f32 %v448_v8, %v424_v57  ;;  %506 = vmatpush.msrb.mxu2 %v473_v18 }
 0x542   :  { %v451_v11 = vrot.slane %v449_v10, 2  ;;  %507 = vmatpush.msrb.mxu2 %v472_v19 }
 0x544   :  { %456 = vrot.lane.b32.xlu1 %v451_v11, %s646_s25  ;;  %v454_v12 = vsub.f32 %v449_v10, %v451_v11  ;;  %v453_v14 = vmul.f32 %v451_v11, %v449_v10 }
 0x546   :  { %v455_v13 = vand.u32 2147483647, %v454_v12 }
 0x548   :  { %464 = vrot.lane.b32.xlu0 %v455_v13, %s647_s26 }
 0x54c   :  { %460 = vrot.lane.b32.xlu1 %v453_v14, %s648_s2 }
 0x5b6   :  { %v457_v20 = vpop.permute.xlu1 %456 }
 0x5b7   :  { %v467_v21 = vsel %vm275_vm4, %v449_v10, %v457_v20 }
 0x5ba   :  { %v465_v23 = vpop.permute.xlu0 %464 }
 0x5be   :  { %v461_v22 = vpop.permute.xlu1 %460 }
 0x5bf   :  { %v469_v24 = vsel %vm468_vm5, %v467_v21, %v461_v22 }
 0x5c0   :  { %v471_v25 = vsel %vm470_vm6, %v469_v24, %v465_v23 }
 0x5c1   :  { %508 = vmatmul.f32.vlgmr.msrb.gmra.mxu2 %v471_v25 }
 0x644   :  { %v509_v27 = vpop.f32.mrf.mxu2 }
 0x645   :  { %v510_v28 = vadd.f32 %v594_v26, %v509_v27 }
 0x647   :  { %513 = vst.msk [vmem:[#allocation2] sm:$0x3] %vm512_vm7, %v510_v28 }
 0x648   :  { %524 = dma.vmem_to_hbm [thread:$0]  %s520_s15, 32, %s522_s4, [#allocation3]  }
 0x649   :  { %635 = dma.done.wait [#allocation3], 32  }
 0x64a   :  { %636 = vsyncadd [#allocation3], 4294967264 }
 0x64b   :  { %529 = vsyncpa [#allocation3], 1 }

</bundles_post_ra>
